<compile_context>
chip_gen: v6e
topology: v6e:2x2x1
jax: 0.10.0
libtpu: 0.0.40
codegen_flags: <defaults>
</compile_context>

<pallas_src>
import jax
import jax.numpy as jnp
from jax.experimental import pallas as pl
from jax.experimental.pallas import tpu as pltpu


def _make_dma_concat_kernel(num_inputs, flat_sizes):
    """Kernel body: one HBM->HBM DMA per input into its output slice."""
    offsets = [0]
    for s in flat_sizes:
        offsets.append(offsets[-1] + s)

    def kernel(*refs):
        in_refs = refs[:num_inputs]
        o_ref = refs[num_inputs]
        sem = refs[num_inputs + 1]
        copies = []
        # Start all DMAs (they overlap), then wait on all of them.
        for i, r in enumerate(in_refs):
            cp = pltpu.make_async_copy(
                r,
                o_ref.at[:, offsets[i]:offsets[i + 1]],
                sem.at[i],
            )
            cp.start()
            copies.append(cp)
        for cp in copies:
            cp.wait()

    return kernel


def concat(xs, dimension=1):
    """torch.cat(xs, dim=dimension) as a Pallas TPU kernel (HBM->HBM DMAs)."""
    xs = list(xs)
    assert len(xs) >= 1
    ndim = xs[0].ndim
    d = dimension if dimension >= 0 else dimension + ndim
    base_shape = xs[0].shape
    dtype = xs[0].dtype
    for x in xs:
        assert x.ndim == ndim and x.dtype == dtype
        assert x.shape[:d] == base_shape[:d]
        assert x.shape[d + 1:] == base_shape[d + 1:]

    lead = 1
    for s in base_shape[:d]:
        lead *= int(s)
    rest = 1
    for s in base_shape[d + 1:]:
        rest *= int(s)

    cat_sizes = [int(x.shape[d]) for x in xs]
    c_out = sum(cat_sizes)
    flat_sizes = [c * rest for c in cat_sizes]

    # Lane-dense 2-D views: (lead, C_i * rest). Free reshape of contiguous data.
    xs_flat = [x.reshape(lead, fs) for x, fs in zip(xs, flat_sizes)]

    kernel = _make_dma_concat_kernel(len(xs), flat_sizes)

    out_flat = pl.pallas_call(
        kernel,
        out_shape=jax.ShapeDtypeStruct((lead, sum(flat_sizes)), dtype),
        in_specs=[pl.BlockSpec(memory_space=pl.ANY) for _ in xs],
        out_specs=pl.BlockSpec(memory_space=pl.ANY),
        scratch_shapes=[pltpu.SemaphoreType.DMA((len(xs),))],
    )(*xs_flat)

    out_shape = base_shape[:d] + (c_out,) + base_shape[d + 1:]
    return out_flat.reshape(out_shape)


def concat_channels(xs):
    """Channel (dim=1) concat of NCHW tensors — the YOLO Concat use case."""
    return concat(xs, dimension=1)


if __name__ == "__main__":
    key = jax.random.PRNGKey(0)
    k1, k2, k3 = jax.random.split(key, 3)

    # Small NCHW inputs, as a YOLO-style Concat would see (skip-connection cat).
    x1 = jax.random.normal(k1, (2, 4, 16, 16), dtype=jnp.float32)
    x2 = jax.random.normal(k2, (2, 6, 16, 16), dtype=jnp.float32)
    x3 = jax.random.normal(k3, (2, 2, 16, 16), dtype=jnp.float32)

    out = concat_channels([x1, x2, x3])
    out = jax.block_until_ready(out)

    # Verify against the plain-JAX reference of torch.cat(x, dim=1).
    ref = jnp.concatenate([x1, x2, x3], axis=1)
    assert out.shape == (2, 12, 16, 16)
    assert jnp.array_equal(out, ref)

    print("KERNEL_OK")
</pallas_src>

<mosaic_0001>
module attributes {stable_mosaic.version = 11 : i64} {
  func.func @kernel(%arg0: memref<2x1024xf32, #tpu.memory_space<any>>, %arg1: memref<2x1536xf32, #tpu.memory_space<any>>, %arg2: memref<2x512xf32, #tpu.memory_space<any>>, %arg3: memref<2x3072xf32, #tpu.memory_space<any>>, %arg4: memref<3x!tpu.dma_semaphore, #tpu.memory_space<semaphore_mem>>) attributes {dimension_semantics = [], scalar_prefetch = 0 : i64, scratch_operands = 1 : i64, tpu.core_type = #tpu.core_type<tc>} {
    %c0_i32 = arith.constant 0 : i32
    %c0_i32_0 = arith.constant 0 : i32
    %c0_i32_1 = arith.constant 0 : i32
    %0 = tpu.memref_slice %arg3[%c0_i32_0, %c0_i32_1] : memref<2x3072xf32, #tpu.memory_space<any>> -> memref<2x1024xf32, #tpu.memory_space<any>>
    %1 = tpu.memref_slice %arg4[%c0_i32] : memref<3x!tpu.dma_semaphore, #tpu.memory_space<semaphore_mem>> -> memref<1x!tpu.dma_semaphore, #tpu.memory_space<semaphore_mem>>
    %2 = tpu.memref_squeeze %1 : memref<1x!tpu.dma_semaphore, #tpu.memory_space<semaphore_mem>> -> memref<!tpu.dma_semaphore, #tpu.memory_space<semaphore_mem>>
    tpu.enqueue_dma source(%arg0 : memref<2x1024xf32, #tpu.memory_space<any>>) target(%0 : memref<2x1024xf32, #tpu.memory_space<any>>) target_semaphore(%2 : memref<!tpu.dma_semaphore, #tpu.memory_space<semaphore_mem>>)
    %c1_i32 = arith.constant 1 : i32
    %c0_i32_2 = arith.constant 0 : i32
    %c1024_i32 = arith.constant 1024 : i32
    %3 = tpu.memref_slice %arg3[%c0_i32_2, %c1024_i32] : memref<2x3072xf32, #tpu.memory_space<any>> -> memref<2x1536xf32, #tpu.memory_space<any>>
    %4 = tpu.memref_slice %arg4[%c1_i32] : memref<3x!tpu.dma_semaphore, #tpu.memory_space<semaphore_mem>> -> memref<1x!tpu.dma_semaphore, #tpu.memory_space<semaphore_mem>>
    %5 = tpu.memref_squeeze %4 : memref<1x!tpu.dma_semaphore, #tpu.memory_space<semaphore_mem>> -> memref<!tpu.dma_semaphore, #tpu.memory_space<semaphore_mem>>
    tpu.enqueue_dma source(%arg1 : memref<2x1536xf32, #tpu.memory_space<any>>) target(%3 : memref<2x1536xf32, #tpu.memory_space<any>>) target_semaphore(%5 : memref<!tpu.dma_semaphore, #tpu.memory_space<semaphore_mem>>)
    %c2_i32 = arith.constant 2 : i32
    %c0_i32_3 = arith.constant 0 : i32
    %c2560_i32 = arith.constant 2560 : i32
    %6 = tpu.memref_slice %arg3[%c0_i32_3, %c2560_i32] : memref<2x3072xf32, #tpu.memory_space<any>> -> memref<2x512xf32, #tpu.memory_space<any>>
    %7 = tpu.memref_slice %arg4[%c2_i32] : memref<3x!tpu.dma_semaphore, #tpu.memory_space<semaphore_mem>> -> memref<1x!tpu.dma_semaphore, #tpu.memory_space<semaphore_mem>>
    %8 = tpu.memref_squeeze %7 : memref<1x!tpu.dma_semaphore, #tpu.memory_space<semaphore_mem>> -> memref<!tpu.dma_semaphore, #tpu.memory_space<semaphore_mem>>
    tpu.enqueue_dma source(%arg2 : memref<2x512xf32, #tpu.memory_space<any>>) target(%6 : memref<2x512xf32, #tpu.memory_space<any>>) target_semaphore(%8 : memref<!tpu.dma_semaphore, #tpu.memory_space<semaphore_mem>>)
    %c0_i32_4 = arith.constant 0 : i32
    %c0_i32_5 = arith.constant 0 : i32
    %c0_i32_6 = arith.constant 0 : i32
    %9 = tpu.memref_slice %arg3[%c0_i32_5, %c0_i32_6] : memref<2x3072xf32, #tpu.memory_space<any>> -> memref<2x1024xf32, #tpu.memory_space<any>>
    %10 = tpu.memref_slice %arg4[%c0_i32_4] : memref<3x!tpu.dma_semaphore, #tpu.memory_space<semaphore_mem>> -> memref<1x!tpu.dma_semaphore, #tpu.memory_space<semaphore_mem>>
    %11 = tpu.memref_squeeze %10 : memref<1x!tpu.dma_semaphore, #tpu.memory_space<semaphore_mem>> -> memref<!tpu.dma_semaphore, #tpu.memory_space<semaphore_mem>>
    tpu.wait_dma2 semaphore(%11 : memref<!tpu.dma_semaphore, #tpu.memory_space<semaphore_mem>>) src(%arg0 : memref<2x1024xf32, #tpu.memory_space<any>>) dst(%9 : memref<2x1024xf32, #tpu.memory_space<any>>)
    %c1_i32_7 = arith.constant 1 : i32
    %c0_i32_8 = arith.constant 0 : i32
    %c1024_i32_9 = arith.constant 1024 : i32
    %12 = tpu.memref_slice %arg3[%c0_i32_8, %c1024_i32_9] : memref<2x3072xf32, #tpu.memory_space<any>> -> memref<2x1536xf32, #tpu.memory_space<any>>
    %13 = tpu.memref_slice %arg4[%c1_i32_7] : memref<3x!tpu.dma_semaphore, #tpu.memory_space<semaphore_mem>> -> memref<1x!tpu.dma_semaphore, #tpu.memory_space<semaphore_mem>>
    %14 = tpu.memref_squeeze %13 : memref<1x!tpu.dma_semaphore, #tpu.memory_space<semaphore_mem>> -> memref<!tpu.dma_semaphore, #tpu.memory_space<semaphore_mem>>
    tpu.wait_dma2 semaphore(%14 : memref<!tpu.dma_semaphore, #tpu.memory_space<semaphore_mem>>) src(%arg1 : memref<2x1536xf32, #tpu.memory_space<any>>) dst(%12 : memref<2x1536xf32, #tpu.memory_space<any>>)
    %c2_i32_10 = arith.constant 2 : i32
    %c0_i32_11 = arith.constant 0 : i32
    %c2560_i32_12 = arith.constant 2560 : i32
    %15 = tpu.memref_slice %arg3[%c0_i32_11, %c2560_i32_12] : memref<2x3072xf32, #tpu.memory_space<any>> -> memref<2x512xf32, #tpu.memory_space<any>>
    %16 = tpu.memref_slice %arg4[%c2_i32_10] : memref<3x!tpu.dma_semaphore, #tpu.memory_space<semaphore_mem>> -> memref<1x!tpu.dma_semaphore, #tpu.memory_space<semaphore_mem>>
    %17 = tpu.memref_squeeze %16 : memref<1x!tpu.dma_semaphore, #tpu.memory_space<semaphore_mem>> -> memref<!tpu.dma_semaphore, #tpu.memory_space<semaphore_mem>>
    tpu.wait_dma2 semaphore(%17 : memref<!tpu.dma_semaphore, #tpu.memory_space<semaphore_mem>>) src(%arg2 : memref<2x512xf32, #tpu.memory_space<any>>) dst(%15 : memref<2x512xf32, #tpu.memory_space<any>>)
    return
  }
}

</mosaic_0001>

<bundles_post_ra>
// kernel: tpu_custom_call.1
= control target key start
LH: loop header
LB: loop body
LE: loop exit
PB: predicated region body
PF: predicated region fallthrough
CT: control target
= control target key end

     0   :  { %s77_s15 = smov [#allocation2]   ;;  %s78_s16 = smov 131072   ;;  %s120_s0 = inlined_call_operand.hbm [shape: f32[2,1024], index: 0, kind: input, shape index: {}]   ;;  %s121_s3 = inlined_call_operand.hbm [shape: f32[2,3072], index: 3, kind: output, shape index: {}]   ;;  %s122_s1 = inlined_call_operand.hbm [shape: f32[2,1536], index: 1, kind: input, shape index: {}]   ;;  %s123_s2 = inlined_call_operand.hbm [shape: f32[2,512], index: 2, kind: input, shape index: {}]  }
   0x1   :  { %s15_s14 = scalar_lea.hbm %s121_s3, 256  ;;  %s79_s17 = smov 0  }
   0x2   :  { %14 = dma.general %s120_s0, 256, %s121_s3, %s77_s15, %s78_s16, [#allocation4], %s79_s17, 0  }
   0x3   :  { %s24_s24 = scalar_lea.hbm %s121_s3, 640  ;;  %s80_s25 = smov [#allocation2 + $0x1]  }
   0x4   :  { %23 = dma.general %s122_s1, 384, %s15_s14, %s80_s25, %s78_s16, [#allocation6], %s79_s17, 0  }
   0x5   :  { %s81_s28 = smov [#allocation2 + $0x2]  }
   0x6   :  { %32 = dma.general %s123_s2, 128, %s24_s24, %s81_s28, %s78_s16, [#allocation8], %s79_s17, 0  }
   0x7   :  { %71 = dma.done.wait [#allocation2], 256 }
   0x8   :  { %72 = vsyncadd [#allocation2], 4294967040 }
   0x9   :  { %73 = dma.done.wait [#allocation2 + $0x1], 384 }
   0xa   :  { %74 = vsyncadd [#allocation2 + $0x1], 4294966912 }
   0xb   :  { %75 = dma.done.wait [#allocation2 + $0x2], 128 }
   0xc   :  { %76 = vsyncadd [#allocation2 + $0x2], 4294967168 }
   0xd   :  { %43 = vsyncmov [#allocation2] }
  0x10   :  { %s44_s0 = vpop.sfrf %43 }
  0x11   :  { %p63_p0 = scmp.ne.s32.totalorder %s44_s0, 0 }
  0x13   :  { %48 = shalt.err (%p63_p0)  }
  0x14   :  { %50 = vsyncmov [#allocation2 + $0x1] }
  0x17   :  { %s51_s3 = vpop.sfrf %50 }
  0x18   :  { %p64_p1 = scmp.ne.s32.totalorder %s51_s3, 0 }
  0x1a   :  { %55 = shalt.err (%p64_p1)  }
  0x1b   :  { %57 = vsyncmov [#allocation2 + $0x2] }
  0x1e   :  { %s58_s1 = vpop.sfrf %57 }
  0x1f   :  { %p65_p2 = scmp.ne.s32.totalorder %s58_s1, 0 }
  0x21   :  { %62 = shalt.err (%p65_p2)  }

</bundles_post_ra>
